<compile_context>
chip_gen: v7x
topology: tpu7x:2x2x1
jax: 0.10.0
libtpu: 0.0.40
codegen_flags: <defaults>
</compile_context>

<pallas_src>
import functools

import jax
import jax.numpy as jnp
from jax.experimental import pallas as pl
from jax.experimental.pallas import tpu as pltpu


def ffn_kernel(x_ref, w1t_ref, b1_ref, w2t_ref, b2_ref, o_ref,
               xn_ref, acc_ref, *, d_orig, eps):
    h_idx = pl.program_id(1)

    @pl.when(h_idx == 0)
    def _init():
        # LayerNorm over the (original, unpadded) feature dim; one-pass stats.
        # Padded feature columns are zero so sums are unaffected; divisor is d_orig.
        x = x_ref[...].astype(jnp.float32)
        inv_d = 1.0 / d_orig
        s = jnp.sum(x, axis=-1, keepdims=True)
        ss = jnp.sum(x * x, axis=-1, keepdims=True)
        mean = s * inv_d
        var = ss * inv_d - mean * mean
        xn = (x - mean) * jax.lax.rsqrt(var + eps)
        xn_ref[...] = xn.astype(xn_ref.dtype)          # cached, reused for all H slices
        acc_ref[...] = jnp.zeros_like(acc_ref)

    # w_1 slice: (D_pad, tH); gamma/beta already folded into w1t/b1. ReLU per H slice.
    hblk = jnp.dot(xn_ref[...], w1t_ref[...], preferred_element_type=jnp.float32)
    hblk = jnp.maximum(hblk + b1_ref[...], 0.0)
    # TODO(synk): dropout_1 is identity in eval mode; training-mode RNG dropout not implemented.

    # w_2 slice: (tH, D_pad); accumulate into f32 scratch.
    acc_ref[...] += jnp.dot(hblk.astype(w2t_ref.dtype), w2t_ref[...],
                            preferred_element_type=jnp.float32)

    @pl.when(h_idx == pl.num_programs(1) - 1)
    def _finalize():
        out = acc_ref[...] + b2_ref[...] + x_ref[...].astype(jnp.float32)
        o_ref[...] = out.astype(o_ref.dtype)


def _round_up(x, m):
    return ((x + m - 1) // m) * m


def ffn_pallas(x, w1, b1, w2, b2, gamma, beta, *, tm=256, th=512, eps=1e-6):
    """x: [B, S, D]; w1: [H, D]; b1: [H]; w2: [D, H]; b2: [D]; gamma/beta: [D]."""
    B, S, D = x.shape
    H = w1.shape[0]
    M = B * S

    # Tile sizes: row tile is a multiple of 8 (sublanes), H tile a multiple of 128 (lanes).
    tm = min(tm, _round_up(M, 8))
    D_pad = _round_up(D, 128)
    th = min(th, _round_up(H, 128))
    H_pad = _round_up(H, th)
    M_pad = _round_up(M, tm)

    x2 = x.reshape(M, D).astype(jnp.float32)
    x2 = jnp.pad(x2, ((0, M_pad - M), (0, D_pad - D)))

    # Fold LayerNorm affine into W1 / b1 (exact for eval-mode FFN):
    #   (xn*gamma + beta) @ W1^T + b1 == xn @ (gamma[:,None]*W1^T) + (beta @ W1^T + b1)
    w1t = gamma[:, None] * w1.T                        # (D, H)
    b1f = b1 + beta @ w1.T                             # (H,)
    w2t = w2.T                                         # (H, D)

    w1t = jnp.pad(w1t, ((0, D_pad - D), (0, H_pad - H))).astype(jnp.bfloat16)
    w2t = jnp.pad(w2t, ((0, H_pad - H), (0, D_pad - D))).astype(jnp.bfloat16)
    b1p = jnp.pad(b1f, (0, H_pad - H)).reshape(1, H_pad).astype(jnp.float32)
    b2p = jnp.pad(b2, (0, D_pad - D)).reshape(1, D_pad).astype(jnp.float32)

    grid = (M_pad // tm, H_pad // th)
    kernel = functools.partial(ffn_kernel, d_orig=float(D), eps=float(eps))

    out = pl.pallas_call(
        kernel,
        out_shape=jax.ShapeDtypeStruct((M_pad, D_pad), x.dtype),
        grid_spec=pltpu.PrefetchScalarGridSpec(
            num_scalar_prefetch=0,
            grid=grid,
            in_specs=[
                pl.BlockSpec((tm, D_pad), lambda i, h: (i, 0)),   # x row tile
                pl.BlockSpec((D_pad, th), lambda i, h: (0, h)),   # W1^T slice (gamma folded)
                pl.BlockSpec((1, th), lambda i, h: (0, h)),       # b1 slice (beta folded)
                pl.BlockSpec((th, D_pad), lambda i, h: (h, 0)),   # W2^T slice
                pl.BlockSpec((1, D_pad), lambda i, h: (0, 0)),    # b2
            ],
            out_specs=pl.BlockSpec((tm, D_pad), lambda i, h: (i, 0)),
            scratch_shapes=[
                pltpu.VMEM((tm, D_pad), jnp.bfloat16),   # cached LayerNorm(x) (bf16 MXU input)
                pltpu.VMEM((tm, D_pad), jnp.float32),    # f32 accumulator for second matmul
            ],
        ),
        compiler_params=pltpu.CompilerParams(
            dimension_semantics=("parallel", "arbitrary"),
            vmem_limit_bytes=64 * 1024 * 1024,
        ),
    )(x2, w1t, b1p, w2t, b2p)

    return out[:M, :D].reshape(B, S, D)


def ffn_reference(x, w1, b1, w2, b2, gamma, beta):
    xf = x.astype(jnp.float32)
    mean = jnp.mean(xf, axis=-1, keepdims=True)
    var = jnp.mean((xf - mean) ** 2, axis=-1, keepdims=True)
    xn = (xf - mean) / jnp.sqrt(var + 1e-6) * gamma + beta
    h = jnp.maximum(xn @ w1.T + b1, 0.0)
    return (h @ w2.T + b2 + xf).astype(x.dtype)


if __name__ == "__main__":
    key = jax.random.PRNGKey(0)
    B, S = 2, 8
    input_size, hidden_size = 32, 64

    k = jax.random.split(key, 6)
    x = jax.random.normal(k[0], (B, S, input_size), dtype=jnp.float32)
    # Deterministic synthetic params matching nn.Linear / nn.LayerNorm shapes.
    w1 = jax.random.normal(k[1], (hidden_size, input_size), dtype=jnp.float32) * 0.1
    b1 = jax.random.normal(k[2], (hidden_size,), dtype=jnp.float32) * 0.1
    w2 = jax.random.normal(k[3], (input_size, hidden_size), dtype=jnp.float32) * 0.1
    b2 = jax.random.normal(k[4], (input_size,), dtype=jnp.float32) * 0.1
    gamma = jnp.ones((input_size,), dtype=jnp.float32)
    beta = jnp.zeros((input_size,), dtype=jnp.float32)

    out = ffn_pallas(x, w1, b1, w2, b2, gamma, beta)
    jax.block_until_ready(out)

    ref = ffn_reference(x, w1, b1, w2, b2, gamma, beta)
    assert out.shape == (B, S, input_size)
    # bf16 MXU inputs (f32 accumulation) -> loosened tolerance vs the f32 reference.
    assert jnp.allclose(out, ref, atol=3e-2, rtol=3e-2), "mismatch vs reference"
    print("KERNEL_OK")
</pallas_src>

<mosaic_0001>
module attributes {stable_mosaic.version = 11 : i64} {
  func.func @ffn_kernel(%arg0: i32, %arg1: i32, %arg2: memref<16x128xf32, #tpu.memory_space<vmem>>, %arg3: memref<128x128xbf16, #tpu.memory_space<vmem>>, %arg4: memref<1x128xf32, #tpu.memory_space<vmem>>, %arg5: memref<128x128xbf16, #tpu.memory_space<vmem>>, %arg6: memref<1x128xf32, #tpu.memory_space<vmem>>, %arg7: memref<16x128xf32, #tpu.memory_space<vmem>>, %arg8: memref<16x128xbf16, #tpu.memory_space<vmem>>, %arg9: memref<16x128xf32, #tpu.memory_space<vmem>>) attributes {dimension_semantics = [#tpu.dimension_semantics<parallel>, #tpu.dimension_semantics<arbitrary>], iteration_bounds = array<i64: 1, 1>, scalar_prefetch = 0 : i64, scratch_operands = 2 : i64, tpu.core_type = #tpu.core_type<tc>, window_params = [{transform_indices = @transform_0, window_bounds = array<i64: 16, 128>}, {transform_indices = @transform_1, window_bounds = array<i64: 128, 128>}, {transform_indices = @transform_2, window_bounds = array<i64: 1, 128>}, {transform_indices = @transform_3, window_bounds = array<i64: 128, 128>}, {pipeline_mode = #tpu.pipeline_mode<synchronous>, transform_indices = @transform_4, window_bounds = array<i64: 1, 128>}, {transform_indices = @transform_5, window_bounds = array<i64: 16, 128>}]} {
    %c0_i32 = arith.constant 0 : i32
    %0 = arith.cmpi eq, %arg1, %c0_i32 : i32
    %1 = arith.extui %0 : i1 to i32
    %c0_i32_0 = arith.constant 0 : i32
    %2 = arith.cmpi ne, %1, %c0_i32_0 : i32
    scf.if %2 {
      %c0_16 = arith.constant 0 : index
      %c0_17 = arith.constant 0 : index
      %20 = vector.load %arg2[%c0_16, %c0_17] : memref<16x128xf32, #tpu.memory_space<vmem>>, vector<16x128xf32>
      %cst_18 = arith.constant dense<0.000000e+00> : vector<16xf32>
      %21 = vector.multi_reduction <add>, %20, %cst_18 [1] : vector<16x128xf32> to vector<16xf32>
      %22 = vector.shape_cast %21 : vector<16xf32> to vector<16x1xf32>
      %23 = arith.mulf %20, %20 : vector<16x128xf32>
      %cst_19 = arith.constant dense<0.000000e+00> : vector<16xf32>
      %24 = vector.multi_reduction <add>, %23, %cst_19 [1] : vector<16x128xf32> to vector<16xf32>
      %25 = vector.shape_cast %24 : vector<16xf32> to vector<16x1xf32>
      %cst_20 = arith.constant 3.125000e-02 : f32
      %26 = vector.broadcast %cst_20 : f32 to vector<16x1xf32>
      %27 = arith.mulf %22, %26 : vector<16x1xf32>
      %cst_21 = arith.constant 3.125000e-02 : f32
      %28 = vector.broadcast %cst_21 : f32 to vector<16x1xf32>
      %29 = arith.mulf %25, %28 : vector<16x1xf32>
      %30 = arith.mulf %27, %27 : vector<16x1xf32>
      %31 = arith.subf %29, %30 : vector<16x1xf32>
      %32 = vector.broadcast %27 : vector<16x1xf32> to vector<16x128xf32>
      %33 = arith.subf %20, %32 : vector<16x128xf32>
      %cst_22 = arith.constant 9.99999997E-7 : f32
      %34 = vector.broadcast %cst_22 : f32 to vector<16x1xf32>
      %35 = arith.addf %31, %34 : vector<16x1xf32>
      %36 = math.rsqrt %35 : vector<16x1xf32>
      %37 = vector.broadcast %36 : vector<16x1xf32> to vector<16x128xf32>
      %38 = arith.mulf %33, %37 : vector<16x128xf32>
      %39 = arith.truncf %38 : vector<16x128xf32> to vector<16x128xbf16>
      %c0_23 = arith.constant 0 : index
      %c0_24 = arith.constant 0 : index
      %40 = vector.load %arg8[%c0_23, %c0_24] : memref<16x128xbf16, #tpu.memory_space<vmem>>, vector<16x128xbf16>
      tpu.vector_store %arg8[%c0_23, %c0_24], %39 {strides = array<i32>} : memref<16x128xbf16, #tpu.memory_space<vmem>>, vector<16x128xbf16>,
      %cst_25 = arith.constant 0.000000e+00 : f32
      %41 = vector.broadcast %cst_25 : f32 to vector<16x128xf32>
      %c0_26 = arith.constant 0 : index
      %c0_27 = arith.constant 0 : index
      %42 = vector.load %arg9[%c0_26, %c0_27] : memref<16x128xf32, #tpu.memory_space<vmem>>, vector<16x128xf32>
      tpu.vector_store %arg9[%c0_26, %c0_27], %41 {strides = array<i32>} : memref<16x128xf32, #tpu.memory_space<vmem>>, vector<16x128xf32>,
    } else {
    }
    %c0 = arith.constant 0 : index
    %c0_1 = arith.constant 0 : index
    %3 = vector.load %arg8[%c0, %c0_1] : memref<16x128xbf16, #tpu.memory_space<vmem>>, vector<16x128xbf16>
    %c0_2 = arith.constant 0 : index
    %c0_3 = arith.constant 0 : index
    %4 = vector.load %arg3[%c0_2, %c0_3] : memref<128x128xbf16, #tpu.memory_space<vmem>>, vector<128x128xbf16>
    %cst = arith.constant dense<0.000000e+00> : vector<16x128xf32>
    %5 = tpu.matmul %3, %4, %cst {dimension_numbers = #tpu.dot_dimension_numbers<[1], [0], [0], [1], [0, 0, 1, 1], [], []>} : vector<16x128xbf16>, vector<128x128xbf16>, vector<16x128xf32> -> vector<16x128xf32>
    %c0_4 = arith.constant 0 : index
    %c0_5 = arith.constant 0 : index
    %6 = vector.load %arg4[%c0_4, %c0_5] : memref<1x128xf32, #tpu.memory_space<vmem>>, vector<1x128xf32>
    %7 = vector.broadcast %6 : vector<1x128xf32> to vector<16x128xf32>
    %8 = arith.addf %5, %7 : vector<16x128xf32>
    %cst_6 = arith.constant 0.000000e+00 : f32
    %9 = vector.broadcast %cst_6 : f32 to vector<16x128xf32>
    %10 = arith.maximumf %8, %9 : vector<16x128xf32>
    %c0_7 = arith.constant 0 : index
    %c0_8 = arith.constant 0 : index
    %11 = vector.load %arg9[%c0_7, %c0_8] : memref<16x128xf32, #tpu.memory_space<vmem>>, vector<16x128xf32>
    %12 = arith.truncf %10 : vector<16x128xf32> to vector<16x128xbf16>
    %c0_9 = arith.constant 0 : index
    %c0_10 = arith.constant 0 : index
    %13 = vector.load %arg5[%c0_9, %c0_10] : memref<128x128xbf16, #tpu.memory_space<vmem>>, vector<128x128xbf16>
    %cst_11 = arith.constant dense<0.000000e+00> : vector<16x128xf32>
    %14 = tpu.matmul %12, %13, %cst_11 {dimension_numbers = #tpu.dot_dimension_numbers<[1], [0], [0], [1], [0, 0, 1, 1], [], []>} : vector<16x128xbf16>, vector<128x128xbf16>, vector<16x128xf32> -> vector<16x128xf32>
    %15 = arith.addf %11, %14 : vector<16x128xf32>
    %c0_12 = arith.constant 0 : index
    %c0_13 = arith.constant 0 : index
    %16 = vector.load %arg9[%c0_12, %c0_13] : memref<16x128xf32, #tpu.memory_space<vmem>>, vector<16x128xf32>
    tpu.vector_store %arg9[%c0_12, %c0_13], %15 {strides = array<i32>} : memref<16x128xf32, #tpu.memory_space<vmem>>, vector<16x128xf32>,
    %c0_i32_14 = arith.constant 0 : i32
    %17 = arith.cmpi eq, %arg1, %c0_i32_14 : i32
    %18 = arith.extui %17 : i1 to i32
    %c0_i32_15 = arith.constant 0 : i32
    %19 = arith.cmpi ne, %18, %c0_i32_15 : i32
    scf.if %19 {
      %c0_16 = arith.constant 0 : index
      %c0_17 = arith.constant 0 : index
      %20 = vector.load %arg9[%c0_16, %c0_17] : memref<16x128xf32, #tpu.memory_space<vmem>>, vector<16x128xf32>
      %c0_18 = arith.constant 0 : index
      %c0_19 = arith.constant 0 : index
      %21 = vector.load %arg6[%c0_18, %c0_19] : memref<1x128xf32, #tpu.memory_space<vmem>>, vector<1x128xf32>
      %22 = vector.broadcast %21 : vector<1x128xf32> to vector<16x128xf32>
      %23 = arith.addf %20, %22 : vector<16x128xf32>
      %c0_20 = arith.constant 0 : index
      %c0_21 = arith.constant 0 : index
      %24 = vector.load %arg2[%c0_20, %c0_21] : memref<16x128xf32, #tpu.memory_space<vmem>>, vector<16x128xf32>
      %25 = arith.addf %23, %24 : vector<16x128xf32>
      %c0_22 = arith.constant 0 : index
      %c0_23 = arith.constant 0 : index
      %26 = vector.load %arg7[%c0_22, %c0_23] : memref<16x128xf32, #tpu.memory_space<vmem>>, vector<16x128xf32>
      tpu.vector_store %arg7[%c0_22, %c0_23], %25 {strides = array<i32>} : memref<16x128xf32, #tpu.memory_space<vmem>>, vector<16x128xf32>,
    } else {
    }
    return
  }
  func.func @transform_0(%arg0: i32, %arg1: i32) -> (i32, i32) {
    %c0_i32 = arith.constant 0 : i32
    %c0_i32_0 = arith.constant 0 : i32
    return %arg0, %c0_i32 : i32, i32
  }
  func.func @transform_1(%arg0: i32, %arg1: i32) -> (i32, i32) {
    %c0_i32 = arith.constant 0 : i32
    %c0_i32_0 = arith.constant 0 : i32
    return %c0_i32, %arg1 : i32, i32
  }
  func.func @transform_2(%arg0: i32, %arg1: i32) -> (i32, i32) {
    %c0_i32 = arith.constant 0 : i32
    %c0_i32_0 = arith.constant 0 : i32
    return %c0_i32, %arg1 : i32, i32
  }
  func.func @transform_3(%arg0: i32, %arg1: i32) -> (i32, i32) {
    %c0_i32 = arith.constant 0 : i32
    %c0_i32_0 = arith.constant 0 : i32
    return %arg1, %c0_i32 : i32, i32
  }
  func.func @transform_4(%arg0: i32, %arg1: i32) -> (i32, i32) {
    %c0_i32 = arith.constant 0 : i32
    %c0_i32_0 = arith.constant 0 : i32
    %c0_i32_1 = arith.constant 0 : i32
    return %c0_i32, %c0_i32_0 : i32, i32
  }
  func.func @transform_5(%arg0: i32, %arg1: i32) -> (i32, i32) {
    %c0_i32 = arith.constant 0 : i32
    %c0_i32_0 = arith.constant 0 : i32
    return %arg0, %c0_i32 : i32, i32
  }
}

</mosaic_0001>

<bundles_post_ra>
// kernel: tpu_custom_call.1
= control target key start
LH: loop header
LB: loop body
LE: loop exit
PB: predicated region body
PF: predicated region fallthrough
CT: control target
= control target key end

     0   :  { %10 = vsyncpa [#allocation5], 0  ;;  %s788_s0 = inlined_call_operand.hbm [shape: f32[16,128], index: 0, kind: input, shape index: {}]   ;;  %s789_s1 = inlined_call_operand.hbm [shape: bf16[128,128], index: 1, kind: input, shape index: {}]   ;;  %s790_s2 = inlined_call_operand.hbm [shape: f32[1,128], index: 2, kind: input, shape index: {}]   ;;  %s791_s3 = inlined_call_operand.hbm [shape: bf16[128,128], index: 3, kind: input, shape index: {}]   ;;  %s792_s4 = inlined_call_operand.hbm [shape: f32[1,128], index: 4, kind: input, shape index: {}]   ;;  %s793_s5 = inlined_call_operand.hbm [shape: f32[16,128], index: 5, kind: output, shape index: {}]  }
   0x1   :  { %11 = vsyncpa [#allocation8], 0 }
   0x2   :  { %12 = vsyncpa [#allocation11], 0 }
   0x3   :  { %13 = vsyncpa [#allocation6], 0  ;;  %s636_s18 = smov [#allocation7]   ;;  %s496_s22 = scalar_lea.hbm %s789_s1, 1024 }
   0x4   :  { %s31_s19 = sshll.u32 %s636_s18, 4  ;;  %p497_p0 = scmp.ne.s32.totalorder %s789_s1, %s496_s22  ;;  %s32_s19 = int_to_ptr.vmem [resolvable:$true] %s31_s19 }
   0x5   :  { %p500_p1 = scmp.lt.u32.totalorder %s496_s22, %s789_s1 }
   0x7   :  { %p502_p2 = pnand %p500_p1, %p497_p0 }
   0x9   :  { %505 = shalt.err (!%p502_p2)
}
   0xa   :  { %s506_s27 = scalar_lea.vmem %s32_s19, 1024  ;;  %p511_p4 = scmp.lt.s32.totalorder %s32_s19, %s32_s19 }
   0xb   :  { %p507_p3 = scmp.ne.s32.totalorder %s32_s19, %s506_s27  ;;  %p512_p5 = scmp.lt.s32.totalorder %s506_s27, %s506_s27 }
   0xd   :  { %p513_p6 = por %p512_p5, %p511_p4 }
   0xf   :  { %p514_p7 = pnand %p513_p6, %p507_p3 }
  0x11   :  { %517 = shalt.err (!%p514_p7)
}
  0x12   :  { %s637_s28 = smov 64   ;;  %s638_s29 = smov 4  }
  0x13   :  { %37 = dma.hbm_to_vmem [thread:$0]  %s789_s1, 1024, %s32_s19, [#allocation8], %s637_s28, %s637_s28, %s638_s29  }
  0x14   :  { %s639_s7 = smov [#allocation10]   ;;  %s640_s9 = smov [#allocation4]  }
  0x15   :  { %s53_s8 = sshll.u32 %s639_s7, 4  ;;  %s19_s10 = sshll.u32 %s640_s9, 4  ;;  %s54_s8 = int_to_ptr.vmem [resolvable:$true] %s53_s8  ;;  %s20_s10 = int_to_ptr.vmem [resolvable:$true] %s19_s10 }
  0x16   :  { %s518_s13 = scalar_lea.hbm %s791_s3, 1024 }
  0x17   :  { %p519_p8 = scmp.ne.s32.totalorder %s791_s3, %s518_s13  ;;  %p522_p9 = scmp.lt.u32.totalorder %s518_s13, %s791_s3 }
  0x19   :  { %p524_p10 = pnand %p522_p9, %p519_p8 }
  0x1b   :  { %527 = shalt.err (!%p524_p10)
}
  0x1c   :  { %s528_s1 = scalar_lea.vmem %s54_s8, 1024  ;;  %p533_p12 = scmp.lt.s32.totalorder %s54_s8, %s54_s8 }
  0x1d   :  { %p529_p11 = scmp.ne.s32.totalorder %s54_s8, %s528_s1  ;;  %p534_p13 = scmp.lt.s32.totalorder %s528_s1, %s528_s1 }
  0x1f   :  { %p535_p0 = por %p534_p13, %p533_p12 }
  0x21   :  { %p536_p1 = pnand %p535_p0, %p529_p11 }
  0x23   :  { %539 = shalt.err (!%p536_p1)
}
  0x24   :  { %59 = dma.hbm_to_vmem [thread:$0]  %s791_s3, 1024, %s54_s8, [#allocation11], %s637_s28, %s637_s28, %s638_s29  }
  0x25   :  { %s540_s22 = scalar_lea.hbm %s788_s0, 256 }
  0x26   :  { %p541_p2 = scmp.ne.s32.totalorder %s788_s0, %s540_s22  ;;  %p544_p3 = scmp.lt.u32.totalorder %s540_s22, %s788_s0 }
  0x28   :  { %p546_p4 = pnand %p544_p3, %p541_p2 }
  0x2a   :  { %549 = shalt.err (!%p546_p4)
}
  0x2b   :  { %s550_s27 = scalar_lea.vmem %s20_s10, 256  ;;  %p555_p6 = scmp.lt.s32.totalorder %s20_s10, %s20_s10 }
  0x2c   :  { %p551_p5 = scmp.ne.s32.totalorder %s20_s10, %s550_s27  ;;  %p556_p7 = scmp.lt.s32.totalorder %s550_s27, %s550_s27 }
  0x2e   :  { %p557_p8 = por %p556_p7, %p555_p6 }
  0x30   :  { %p558_p9 = pnand %p557_p8, %p551_p5 }
  0x32   :  { %561 = shalt.err (!%p558_p9)
}
  0x33   :  { %s641_s3 = smov 128   ;;  %s642_s28 = smov 8  }
  0x34   :  { %25 = dma.hbm_to_vmem [thread:$0]  %s788_s0, 256, %s20_s10, [#allocation5], %s641_s3, %s641_s3, %s642_s28  }
  0x35   :  { %s643_s6 = smov [#allocation9]   ;;  %s644_s8 = smov [#allocation12]  }
  0x36   :  { %s44_s7 = sshll.u32 %s643_s6, 4  ;;  %s66_s9 = sshll.u32 %s644_s8, 4  ;;  %s45_s7 = int_to_ptr.vmem [resolvable:$true] %s44_s7  ;;  %s67_s9 = int_to_ptr.vmem [resolvable:$true] %s66_s9 }
  0x37   :  { %s562_s13 = scalar_lea.hbm %s790_s2, 16 }
  0x38   :  { %p563_p10 = scmp.ne.s32.totalorder %s790_s2, %s562_s13  ;;  %p566_p11 = scmp.lt.u32.totalorder %s562_s13, %s790_s2 }
  0x3a   :  { %p568_p12 = pnand %p566_p11, %p563_p10 }
  0x3c   :  { %571 = shalt.err (!%p568_p12)
}
  0x3d   :  { %s572_s0 = scalar_lea.vmem %s45_s7, 16  ;;  %s576_s10 = scalar_lea.vmem %s45_s7, 32 }
  0x3e   :  { %p573_p13 = scmp.ne.s32.totalorder %s45_s7, %s572_s0  ;;  %p577_p0 = scmp.lt.s32.totalorder %s45_s7, %s45_s7 }
  0x3f   :  { %p578_p1 = scmp.lt.s32.totalorder %s576_s10, %s572_s0 }
  0x41   :  { %p579_p2 = por %p578_p1, %p577_p0 }
  0x43   :  { %p580_p3 = pnand %p579_p2, %p573_p13 }
  0x45   :  { %583 = shalt.err (!%p580_p3)
}
  0x46   :  { %47 = dma.hbm_to_vmem [thread:$0]  %s790_s2, 16, %s45_s7, [#allocation8]  }
  0x47   :  { %s584_s21 = scalar_lea.hbm %s792_s4, 16 }
  0x48   :  { %p585_p4 = scmp.ne.s32.totalorder %s792_s4, %s584_s21  ;;  %p588_p5 = scmp.lt.u32.totalorder %s584_s21, %s792_s4 }
  0x4a   :  { %p590_p6 = pnand %p588_p5, %p585_p4 }
  0x4c   :  { %593 = shalt.err (!%p590_p6)
}
  0x4d   :  { %s594_s26 = scalar_lea.vmem %s67_s9, 16  ;;  %s598_s27 = scalar_lea.vmem %s67_s9, 32 }
  0x4e   :  { %p595_p7 = scmp.ne.s32.totalorder %s67_s9, %s594_s26  ;;  %p599_p8 = scmp.lt.s32.totalorder %s67_s9, %s67_s9 }
  0x4f   :  { %p600_p9 = scmp.lt.s32.totalorder %s598_s27, %s594_s26 }
  0x51   :  { %p601_p10 = por %p600_p9, %p599_p8 }
  0x53   :  { %p602_p11 = pnand %p601_p10, %p595_p7 }
  0x55   :  { %605 = shalt.err (!%p602_p11)
}
  0x56   :  { %69 = dma.hbm_to_vmem [thread:$0]  %s792_s4, 16, %s67_s9, [#allocation11]  }
  0x57   :  { %628 = dma.done.wait [#allocation5], 256  }
  0x58   :  { %629 = vsyncadd [#allocation5], 4294967040 }
  0x59   :  { %630 = dma.done.wait [#allocation8], 1040  }
  0x5a   :  { %631 = vsyncadd [#allocation8], 4294966256 }
  0x5b   :  { %632 = dma.done.wait [#allocation11], 1040  }
  0x5c   :  { %633 = vsyncadd [#allocation11], 4294966256  ;;  %v645_v0 = vmov 0.0   ;;  %v743_v1 = vld [vmem:[#allocation4] sm:$0xff]  ;;  %v745_v2 = vld [vmem:[#allocation4 + $0x8] sm:$0xff]  ;;  %vm646_vm0 = vmmov 0  }
  0x5d   :  { %424 = vmatprep.subr.bf16.mxu0 %v645_v0  ;;  %444 = vmatprep.subr.bf16.mxu1 %v645_v0  ;;  %v96_v3 = vmul.f32 %v743_v1, %v743_v1  ;;  %v476_v4 = vld [vmem:[#allocation7] sm:$0xff]   ;;  %v97_v5 = vmul.f32 %v745_v2, %v745_v2  ;;  %v477_v6 = vld [vmem:[#allocation7 + $0x8] sm:$0xff]   ;;  %v478_v7 = vld [vmem:[#allocation7 + $0x10] sm:$0xff]   ;;  %s647_s4 = smov [#allocation13]  }
  0x5e   :  { %92 = vadd.xlane.f32.xlu0 %v743_v1  ;;  %425 = vmatpush3.bf16.msra.mxu0 %v476_v4  ;;  %v479_v8 = vld [vmem:[#allocation7 + $0x18] sm:$0xff]   ;;  %v480_v9 = vld [vmem:[#allocation7 + $0x20] sm:$0xff]   ;;  %v481_v10 = vld [vmem:[#allocation7 + $0x28] sm:$0xff]   ;;  %s374_s30 = sshll.u32 %s647_s4, 4  ;;  %s375_s30 = int_to_ptr.vmem [resolvable:$true] %s374_s30 }
  0x5f   :  { %98 = vadd.xlane.f32.xlu1 %v96_v3  ;;  %426 = vmatprep.subr.bf16.mxu0 %v645_v0  ;;  %v482_v11 = vld [vmem:[#allocation7 + $0x30] sm:$0xff]   ;;  %v483_v12 = vld [vmem:[#allocation7 + $0x38] sm:$0xff]   ;;  %v484_v13 = vld [vmem:[#allocation10] sm:$0xff]   ;;  %s606_s6 = scalar_lea.vmem %s375_s30, 256  ;;  %p611_p13 = scmp.lt.s32.totalorder %s375_s30, %s375_s30 }
  0x60   :  { %440 = vmatprep.mubr.msk.bf16.mxu0 %vm646_vm0, %v645_v0  ;;  %460 = vmatprep.mubr.msk.bf16.mxu1 %vm646_vm0, %v645_v0  ;;  %v485_v14 = vld [vmem:[#allocation10 + $0x8] sm:$0xff]   ;;  %v486_v15 = vld [vmem:[#allocation10 + $0x10] sm:$0xff]   ;;  %v487_v16 = vld [vmem:[#allocation10 + $0x18] sm:$0xff]   ;;  %p607_p12 = scmp.ne.s32.totalorder %s375_s30, %s606_s6  ;;  %p612_p0 = scmp.lt.s32.totalorder %s606_s6, %s606_s6 }
  0x61   :  { %445 = vmatpush3.bf16.msra.mxu1 %v484_v13  ;;  %v488_v17 = vld [vmem:[#allocation10 + $0x20] sm:$0xff]   ;;  %v489_v18 = vld [vmem:[#allocation10 + $0x28] sm:$0xff]   ;;  %v490_v40 = vld [vmem:[#allocation10 + $0x30] sm:$0xff]  }
  0x62   :  { %94 = vadd.xlane.f32.xlu0 %v745_v2  ;;  %427 = vmatpush3.bf16.msra.mxu0 %v477_v6  ;;  %v491_v41 = vld [vmem:[#allocation10 + $0x38] sm:$0xff]   ;;  %v405_v52 = vld [vmem:[#allocation12] ss:$0 sm:$0xff]  ;;  %p613_p1 = por %p612_p0, %p611_p13 }
  0x63   :  { %100 = vadd.xlane.f32.xlu1 %v97_v5  ;;  %428 = vmatprep.subr.bf16.mxu0 %v645_v0  ;;  %v388_v42 = vld [vmem:[#allocation9] ss:$0 sm:$0xff] }
  0x64   :  { %446 = vmatprep.subr.bf16.mxu1 %v645_v0  ;;  %p614_p2 = pnand %p613_p1, %p607_p12 }
  0x65   :  { %447 = vmatpush3.bf16.msra.mxu1 %v485_v14 }
  0x66   :  { %429 = vmatpush3.bf16.msra.mxu0 %v478_v7  ;;  %448 = vmatprep.subr.bf16.mxu1 %v645_v0 }
  0x67   :  { %430 = vmatprep.subr.bf16.mxu0 %v645_v0 }
  0x69   :  { %449 = vmatpush3.bf16.msra.mxu1 %v486_v15 }
  0x6a   :  { %431 = vmatpush3.bf16.msra.mxu0 %v479_v8  ;;  %450 = vmatprep.subr.bf16.mxu1 %v645_v0 }
  0x6b   :  { %432 = vmatprep.subr.bf16.mxu0 %v645_v0 }
  0x6d   :  { %451 = vmatpush3.bf16.msra.mxu1 %v487_v16 }
  0x6e   :  { %433 = vmatpush3.bf16.msra.mxu0 %v480_v9  ;;  %452 = vmatprep.subr.bf16.mxu1 %v645_v0 }
  0x6f   :  { %434 = vmatprep.subr.bf16.mxu0 %v645_v0 }
  0x71   :  { %453 = vmatpush3.bf16.msra.mxu1 %v488_v17 }
  0x72   :  { %435 = vmatpush3.bf16.msra.mxu0 %v481_v10  ;;  %454 = vmatprep.subr.bf16.mxu1 %v645_v0 }
  0x73   :  { %436 = vmatprep.subr.bf16.mxu0 %v645_v0 }
  0x75   :  { %455 = vmatpush3.bf16.msra.mxu1 %v489_v18 }
  0x76   :  { %437 = vmatpush3.bf16.msra.mxu0 %v482_v11  ;;  %456 = vmatprep.subr.bf16.mxu1 %v645_v0 }
  0x77   :  { %438 = vmatprep.subr.bf16.mxu0 %v645_v0 }
  0x79   :  { %457 = vmatpush3.bf16.msra.mxu1 %v490_v40 }
  0x7a   :  { %439 = vmatpush3.bf16.msra.mxu0 %v483_v12  ;;  %458 = vmatprep.subr.bf16.mxu1 %v645_v0 }
  0x7d   :  { %459 = vmatpush3.bf16.msra.mxu1 %v491_v41 }
  0xeb   :  { %v93_v19 = vpop.xlane.xlu0 %92 }
  0xec   :  { %v102_v20 = vmul.f32 0.03125, %v93_v19  ;;  %v99_v21 = vpop.xlane.xlu1 %98 }
  0xed   :  { %v104_v23 = vmul.f32 0.03125, %v99_v21 }
  0xee   :  { %v106_v22 = vmul.f32 %v102_v20, %v102_v20  ;;  %v110_v34 = vsub.f32 %v743_v1, %v102_v20 }
  0xef   :  { %v95_v24 = vpop.xlane.xlu0 %94 }
  0xf0   :  { %v108_v25 = vsub.f32 %v104_v23, %v106_v22  ;;  %v103_v26 = vmul.f32 0.03125, %v95_v24  ;;  %v101_v27 = vpop.xlane.xlu1 %100 }
  0xf1   :  { %v105_v30 = vmul.f32 0.03125, %v101_v27 }
  0xf2   :  { %v112_v28 = vadd.f32 1e-06, %v108_v25  ;;  %v107_v29 = vmul.f32 %v103_v26, %v103_v26  ;;  %v111_v35 = vsub.f32 %v745_v2, %v103_v26 }
  0xf4   :  { %v109_v31 = vsub.f32 %v105_v30, %v107_v29  ;;  %492 = vrsqrt.f32 %v112_v28 }
  0xf6   :  { %v113_v32 = vadd.f32 1e-06, %v109_v31 }
  0xf8   :  { %494 = vrsqrt.f32 %v113_v32 }
  0xfe   :  { %v493_v33 = vpop.eup %492 }
  0xff   :  { %v116_v37 = vmul.f32 %v493_v33, %v110_v34 }
 0x102   :  { %v495_v36 = vpop.eup %494 }
 0x103   :  { %v117_v38 = vmul.f32 %v495_v36, %v111_v35 }
 0x105   :  { %v118_v39 = vpack.c.bf16 %v117_v38, %v116_v37 }
 0x107   :  { %441 = vmatmul.mubr.bf16.vlgmr.msra.gmra.mrb[0].mxu0 %v118_v39 }
 0x1da   :  { %v228_v43 = vpop.f32.mrb[0].mxu0 }
 0x1db   :  { %v229_v44 = vadd.f32 %v388_v42, %v228_v43  ;;  %v442_v45 = vpop.f32.mrb[1].mxu0 }
 0x1dc   :  { %v231_v46 = vpop.f32.mrb[2].mxu0 }
 0x1dd   :  { %v232_v47 = vadd.f32 %v388_v42, %v231_v46  ;;  %v443_v48 = vpop.f32.mrb[3].mxu0  ;;  %v235_v49 = vmax.f32 %v229_v44, 0.0 }
 0x1df   :  { %v236_v50 = vmax.f32 %v232_v47, 0.0 }
 0x1e1   :  { %v239_v51 = vpack.c.bf16 %v236_v50, %v235_v49 }
 0x1e3   :  { %461 = vmatmul.mubr.bf16.vlgmr.msra.gmra.mrb[0].mxu1 %v239_v51 }
 0x2b6   :  { %v338_v53 = vpop.f32.mrb[0].mxu1 }
 0x2b7   :  { %v361_v54 = vadd.f32 %v405_v52, %v338_v53  ;;  %v462_v55 = vpop.f32.mrb[1].mxu1 }
 0x2b8   :  { %v341_v56 = vpop.f32.mrb[2].mxu1 }
 0x2b9   :  { %v365_v57 = vadd.f32 %v361_v54, %v743_v1  ;;  %v362_v58 = vadd.f32 %v405_v52, %v341_v56  ;;  %v463_v59 = vpop.f32.mrb[3].mxu1 }
 0x2bb   :  { %367 = vst [vmem:[#allocation13] sm:$0xff] %v365_v57  ;;  %v366_v60 = vadd.f32 %v362_v58, %v745_v2 }
 0x2bd   :  { %368 = vst [vmem:[#allocation13 + $0x8] sm:$0xff] %v366_v60 }
 0x2be   :  { %617 = shalt.err (!%p614_p2)
}
 0x2bf   :  { %s618_s9 = scalar_lea.hbm %s793_s5, 256 }
 0x2c0   :  { %p619_p3 = scmp.ne.s32.totalorder %s793_s5, %s618_s9  ;;  %p622_p4 = scmp.lt.u32.totalorder %s618_s9, %s793_s5 }
 0x2c2   :  { %p624_p5 = pnand %p622_p4, %p619_p3 }
 0x2c4   :  { %627 = shalt.err (!%p624_p5)
}
 0x2c5   :  { %380 = dma.vmem_to_hbm [thread:$0]  %s375_s30, 256, %s793_s5, [#allocation6], %s641_s3, %s641_s3, %s642_s28  }
 0x2c6   :  { %634 = dma.done.wait [#allocation6], 256  }
 0x2c7   :  { %635 = vsyncadd [#allocation6], 4294967040 }
 0x2c8   :  { %384 = vsyncpa [#allocation5], 1 }
 0x2c9   :  { %385 = vsyncpa [#allocation8], 1 }
 0x2ca   :  { %386 = vsyncpa [#allocation11], 1 }
 0x2cb   :  { %387 = vsyncpa [#allocation6], 1 }

</bundles_post_ra>
